<compile_context>
chip_gen: v7x
topology: tpu7x:2x2x1
jax: 0.10.0
libtpu: 0.0.40
codegen_flags: <defaults>
</compile_context>

<pallas_src>
import jax
import jax.numpy as jnp
from jax import lax
from jax.experimental import pallas as pl
from jax.experimental.pallas import tpu as pltpu


def cross_attention_kernel(x1_ref, x2_ref, ln_w_ref, ln_b_ref, w_qvk_ref, b_qvk_ref,
                           o_ref, *, eps=1e-5):
    bb, s, d = x1_ref.shape          # [batch-block, seq, hidden]
    rows = bb * s

    ln_w = ln_w_ref[...]             # [1, D]
    ln_b = ln_b_ref[...]             # [1, D]

    # Stack all x1 rows on top of all x2 rows so LayerNorm + the fused Q|V|K projection run as
    # a single VPU pass and a single MXU matmul ([2*BB*S, D] @ [D, 3D]).
    x = jnp.concatenate([x1_ref[...].reshape(rows, d),
                         x2_ref[...].reshape(rows, d)], axis=0)            # [2*rows, D]
    mu = jnp.mean(x, axis=-1, keepdims=True)
    xc = x - mu
    var = jnp.mean(xc * xc, axis=-1, keepdims=True)
    xn = xc * lax.rsqrt(var + eps) * ln_w + ln_b                           # [LN(x1); LN(x2)]

    # Fused projection; the 1/sqrt(D) attention scale is already folded into the Q columns of
    # w_qvk / b_qvk at parameter-prep time, so no in-kernel scale multiply is needed.
    proj = jnp.dot(xn, w_qvk_ref[...],
                   preferred_element_type=jnp.float32) + b_qvk_ref[...]    # [2*rows, 3D]

    q_ = proj[:rows, 0:d].reshape(bb, s, d)          # Q(LN(x1)) * scale
    v_ = proj[:rows, d:2 * d].reshape(bb, s, d)      # V(LN(x1))
    k_ = proj[rows:, 2 * d:3 * d].reshape(bb, s, d)  # K(LN(x2))

    # Batched QK^T: contract the last dim of both operands (no explicit transpose).
    attn = jnp.einsum('bqd,bkd->bqk', q_, k_,
                      preferred_element_type=jnp.float32)                  # [BB, S, S]

    # Numerically stable softmax; approximate reciprocal runs on the otherwise-idle EUP.
    m = jnp.max(attn, axis=-1, keepdims=True)
    e = jnp.exp(attn - m)
    p = e * pl.reciprocal(jnp.sum(e, axis=-1, keepdims=True), approx=True)

    ctx = jnp.einsum('bqk,bkd->bqd', p, v_,
                     preferred_element_type=jnp.float32)                   # [BB, S, D]

    # Residual is LN(x1) (the module's `v`), NOT the projected v_.
    o_ref[...] = xn[:rows].reshape(bb, s, d) + ctx


def prepare_params(params):
    """One-time parameter fusion (analogue of work done at module init, NOT per call):
    transpose nn.Linear weights to [in, out], concatenate into one [D, 3D] Q|V|K weight,
    and fold the 1/sqrt(D) attention scale into the Q weight and bias."""
    d = params["wq"].shape[0]
    scale = float(d) ** (-0.5)
    ln_w = params["ln_w"].reshape(1, d)
    ln_b = params["ln_b"].reshape(1, d)
    w_qvk = jnp.concatenate(
        [params["wq"].T * scale, params["wv"].T, params["wk"].T], axis=1)   # [D, 3D]
    b_qvk = jnp.concatenate(
        [params["bq"] * scale, params["bv"], params["bk"]], axis=0).reshape(1, 3 * d)
    return ln_w, ln_b, w_qvk, b_qvk


@jax.jit
def cross_attention(x1, x2, ln_w, ln_b, w_qvk, b_qvk):
    """Batched CrossAttention forward: x1, x2 are [B, S, D]; each batch element is one
    independent instance of the PyTorch module's forward (i.e. vmap of the module)."""
    B, S, D = x1.shape
    assert x2.shape == (B, S, D), "module requires x1 and x2 of identical shape (S1 == S2)"

    # Instances per grid step. At these tiny shapes 4 instances/step is plenty; at realistic
    # sizes pick the largest block that fits VMEM to amortize the ~0.35 us/step overhead.
    bb = min(4, B)
    assert B % bb == 0, "batch must be divisible by the batch block"

    grid_spec = pltpu.PrefetchScalarGridSpec(
        num_scalar_prefetch=0,
        grid=(B // bb,),
        in_specs=[
            pl.BlockSpec((bb, S, D), lambda b: (b, 0, 0)),     # x1 batch block
            pl.BlockSpec((bb, S, D), lambda b: (b, 0, 0)),     # x2 batch block
            # Parameters: constant index maps -> resident across grid steps (no re-DMA).
            pl.BlockSpec((1, D), lambda b: (0, 0)),
            pl.BlockSpec((1, D), lambda b: (0, 0)),
            pl.BlockSpec((D, 3 * D), lambda b: (0, 0)),
            pl.BlockSpec((1, 3 * D), lambda b: (0, 0)),
        ],
        out_specs=pl.BlockSpec((bb, S, D), lambda b: (b, 0, 0)),
    )
    return pl.pallas_call(
        cross_attention_kernel,
        out_shape=jax.ShapeDtypeStruct((B, S, D), jnp.float32),
        grid_spec=grid_spec,
        compiler_params=pltpu.CompilerParams(
            # Independent batch blocks: shard across both TensorCores on v7x.
            dimension_semantics=("parallel",)),
    )(x1, x2, ln_w, ln_b, w_qvk, b_qvk)


def reference(x1, x2, params):
    """Pure-JAX reference, literal translation of the PyTorch module, vmapped over batch."""
    D = x1.shape[-1]
    scale = float(D) ** (-0.5)
    eps = 1e-5

    def ln(x):
        mu = jnp.mean(x, axis=-1, keepdims=True)
        var = jnp.mean((x - mu) ** 2, axis=-1, keepdims=True)
        return (x - mu) / jnp.sqrt(var + eps) * params["ln_w"] + params["ln_b"]

    def single(a, b):
        q, k, v = ln(a), ln(b), ln(a)
        q_ = q @ params["wq"].T + params["bq"]
        k_ = k @ params["wk"].T + params["bk"]
        v_ = v @ params["wv"].T + params["bv"]
        attn = scale * (q_ @ k_.T)
        p = jax.nn.softmax(attn, axis=-1)
        return v + p @ v_

    return jax.vmap(single)(x1, x2)


if __name__ == "__main__":
    # args.hidden_size = 32, args.n_head = 4 (n_head unused by forward).
    # The module requires len(x1) == len(x2); B independent instances batched per call.
    D, S, B = 32, 16, 8

    key = jax.random.PRNGKey(0)
    ks = jax.random.split(key, 8)
    x1 = jax.random.normal(ks[0], (B, S, D), dtype=jnp.float32)
    x2 = jax.random.normal(ks[1], (B, S, D), dtype=jnp.float32)

    bound = 1.0 / (D ** 0.5)
    params = {
        "ln_w": jnp.ones((D,), jnp.float32),
        "ln_b": jnp.zeros((D,), jnp.float32),
        "wq": jax.random.uniform(ks[2], (D, D), jnp.float32, -bound, bound),
        "bq": jax.random.uniform(ks[3], (D,), jnp.float32, -bound, bound),
        "wk": jax.random.uniform(ks[4], (D, D), jnp.float32, -bound, bound),
        "bk": jax.random.uniform(ks[5], (D,), jnp.float32, -bound, bound),
        "wv": jax.random.uniform(ks[6], (D, D), jnp.float32, -bound, bound),
        "bv": jax.random.uniform(ks[7], (D,), jnp.float32, -bound, bound),
    }

    fused = prepare_params(params)   # one-time prep, outside the per-call path
    out = jax.block_until_ready(cross_attention(x1, x2, *fused))
    ref = reference(x1, x2, params)

    assert out.shape == (B, S, D)
    # Tolerance slightly loosened vs exact-division softmax because of the approx (EUP)
    # reciprocal in the softmax denominator.
    assert jnp.allclose(out, ref, atol=2e-3, rtol=2e-3), "mismatch vs JAX reference"
    print("KERNEL_OK")
</pallas_src>

<mosaic_0001>
module attributes {stable_mosaic.version = 11 : i64} {
  func.func @cross_attention_kernel(%arg0: i32, %arg1: memref<4x16x32xf32, #tpu.memory_space<vmem>>, %arg2: memref<4x16x32xf32, #tpu.memory_space<vmem>>, %arg3: memref<1x32xf32, #tpu.memory_space<vmem>>, %arg4: memref<1x32xf32, #tpu.memory_space<vmem>>, %arg5: memref<32x96xf32, #tpu.memory_space<vmem>>, %arg6: memref<1x96xf32, #tpu.memory_space<vmem>>, %arg7: memref<4x16x32xf32, #tpu.memory_space<vmem>>) attributes {dimension_semantics = [#tpu.dimension_semantics<parallel>], iteration_bounds = array<i64: 2>, scalar_prefetch = 0 : i64, scratch_operands = 0 : i64, tpu.core_type = #tpu.core_type<tc>, window_params = [{transform_indices = @transform_0, window_bounds = array<i64: 4, 16, 32>}, {transform_indices = @transform_1, window_bounds = array<i64: 4, 16, 32>}, {pipeline_mode = #tpu.pipeline_mode<synchronous>, transform_indices = @transform_2, window_bounds = array<i64: 1, 32>}, {pipeline_mode = #tpu.pipeline_mode<synchronous>, transform_indices = @transform_3, window_bounds = array<i64: 1, 32>}, {pipeline_mode = #tpu.pipeline_mode<synchronous>, transform_indices = @transform_4, window_bounds = array<i64: 32, 96>}, {pipeline_mode = #tpu.pipeline_mode<synchronous>, transform_indices = @transform_5, window_bounds = array<i64: 1, 96>}, {transform_indices = @transform_6, window_bounds = array<i64: 4, 16, 32>}]} {
    %c0 = arith.constant 0 : index
    %c0_0 = arith.constant 0 : index
    %0 = vector.load %arg3[%c0, %c0_0] : memref<1x32xf32, #tpu.memory_space<vmem>>, vector<1x32xf32>
    %c0_1 = arith.constant 0 : index
    %c0_2 = arith.constant 0 : index
    %1 = vector.load %arg4[%c0_1, %c0_2] : memref<1x32xf32, #tpu.memory_space<vmem>>, vector<1x32xf32>
    %c0_3 = arith.constant 0 : index
    %c0_4 = arith.constant 0 : index
    %c0_5 = arith.constant 0 : index
    %2 = vector.load %arg1[%c0_3, %c0_4, %c0_5] : memref<4x16x32xf32, #tpu.memory_space<vmem>>, vector<4x16x32xf32>
    %3 = vector.shape_cast %2 : vector<4x16x32xf32> to vector<64x32xf32>
    %c0_6 = arith.constant 0 : index
    %c0_7 = arith.constant 0 : index
    %c0_8 = arith.constant 0 : index
    %4 = vector.load %arg2[%c0_6, %c0_7, %c0_8] : memref<4x16x32xf32, #tpu.memory_space<vmem>>, vector<4x16x32xf32>
    %5 = vector.shape_cast %4 : vector<4x16x32xf32> to vector<64x32xf32>
    %6 = tpu.concatenate %3, %5 in 0 : vector<64x32xf32>, vector<64x32xf32> -> vector<128x32xf32>
    %cst = arith.constant dense<0.000000e+00> : vector<128xf32>
    %7 = vector.multi_reduction <add>, %6, %cst [1] : vector<128x32xf32> to vector<128xf32>
    %8 = vector.shape_cast %7 : vector<128xf32> to vector<128x1xf32>
    %cst_9 = arith.constant 3.200000e+01 : f32
    %9 = vector.broadcast %cst_9 : f32 to vector<128x1xf32>
    %10 = arith.divf %8, %9 : vector<128x1xf32>
    %11 = vector.broadcast %10 : vector<128x1xf32> to vector<128x32xf32>
    %12 = arith.subf %6, %11 : vector<128x32xf32>
    %13 = arith.mulf %12, %12 : vector<128x32xf32>
    %cst_10 = arith.constant dense<0.000000e+00> : vector<128xf32>
    %14 = vector.multi_reduction <add>, %13, %cst_10 [1] : vector<128x32xf32> to vector<128xf32>
    %15 = vector.shape_cast %14 : vector<128xf32> to vector<128x1xf32>
    %cst_11 = arith.constant 3.200000e+01 : f32
    %16 = vector.broadcast %cst_11 : f32 to vector<128x1xf32>
    %17 = arith.divf %15, %16 : vector<128x1xf32>
    %cst_12 = arith.constant 9.99999974E-6 : f32
    %18 = vector.broadcast %cst_12 : f32 to vector<128x1xf32>
    %19 = arith.addf %17, %18 : vector<128x1xf32>
    %20 = math.rsqrt %19 : vector<128x1xf32>
    %21 = vector.broadcast %20 : vector<128x1xf32> to vector<128x32xf32>
    %22 = arith.mulf %12, %21 : vector<128x32xf32>
    %23 = vector.broadcast %0 : vector<1x32xf32> to vector<128x32xf32>
    %24 = arith.mulf %22, %23 : vector<128x32xf32>
    %25 = vector.broadcast %1 : vector<1x32xf32> to vector<128x32xf32>
    %26 = arith.addf %24, %25 : vector<128x32xf32>
    %c0_13 = arith.constant 0 : index
    %c0_14 = arith.constant 0 : index
    %27 = vector.load %arg5[%c0_13, %c0_14] : memref<32x96xf32, #tpu.memory_space<vmem>>, vector<32x96xf32>
    %cst_15 = arith.constant dense<0.000000e+00> : vector<128x96xf32>
    %28 = tpu.matmul %26, %27, %cst_15 {dimension_numbers = #tpu.dot_dimension_numbers<[1], [0], [0], [1], [0, 0, 1, 1], [], []>} : vector<128x32xf32>, vector<32x96xf32>, vector<128x96xf32> -> vector<128x96xf32>
    %c0_16 = arith.constant 0 : index
    %c0_17 = arith.constant 0 : index
    %29 = vector.load %arg6[%c0_16, %c0_17] : memref<1x96xf32, #tpu.memory_space<vmem>>, vector<1x96xf32>
    %30 = vector.broadcast %29 : vector<1x96xf32> to vector<128x96xf32>
    %31 = arith.addf %28, %30 : vector<128x96xf32>
    %32 = vector.extract_strided_slice %31 {offsets = [0, 0], sizes = [64, 32], strides = [1, 1]} : vector<128x96xf32> to vector<64x32xf32>
    %33 = vector.shape_cast %32 : vector<64x32xf32> to vector<4x16x32xf32>
    %34 = vector.extract_strided_slice %31 {offsets = [0, 32], sizes = [64, 32], strides = [1, 1]} : vector<128x96xf32> to vector<64x32xf32>
    %35 = vector.shape_cast %34 : vector<64x32xf32> to vector<4x16x32xf32>
    %36 = vector.extract_strided_slice %31 {offsets = [64, 64], sizes = [64, 32], strides = [1, 1]} : vector<128x96xf32> to vector<64x32xf32>
    %37 = vector.shape_cast %36 : vector<64x32xf32> to vector<4x16x32xf32>
    "tpu.trace_start"() <{level = 10 : i32, message = "bqd,bkd->bqk"}> : () -> ()
    %cst_18 = arith.constant dense<0.000000e+00> : vector<4x16x16xf32>
    %38 = tpu.matmul %33, %37, %cst_18 {dimension_numbers = #tpu.dot_dimension_numbers<[2], [2], [1], [1], [0, 0, 0, 1, 1, 1], [0], [0]>} : vector<4x16x32xf32>, vector<4x16x32xf32>, vector<4x16x16xf32> -> vector<4x16x16xf32>
    "tpu.trace_stop"() : () -> ()
    %cst_19 = arith.constant dense<0xFF800000> : vector<4x16xf32>
    %39 = vector.multi_reduction <maximumf>, %38, %cst_19 [2] : vector<4x16x16xf32> to vector<4x16xf32>
    %40 = vector.shape_cast %39 : vector<4x16xf32> to vector<4x16x1xf32>
    %41 = vector.broadcast %40 : vector<4x16x1xf32> to vector<4x16x16xf32>
    %42 = arith.subf %38, %41 : vector<4x16x16xf32>
    %43 = math.exp %42 : vector<4x16x16xf32>
    %cst_20 = arith.constant dense<0.000000e+00> : vector<4x16xf32>
    %44 = vector.multi_reduction <add>, %43, %cst_20 [2] : vector<4x16x16xf32> to vector<4x16xf32>
    %45 = vector.shape_cast %44 : vector<4x16xf32> to vector<4x16x1xf32>
    %46 = tpu.reciprocal %45 {approx = true} : vector<4x16x1xf32> -> vector<4x16x1xf32>
    %47 = vector.broadcast %46 : vector<4x16x1xf32> to vector<4x16x16xf32>
    %48 = arith.mulf %43, %47 : vector<4x16x16xf32>
    "tpu.trace_start"() <{level = 10 : i32, message = "bqk,bkd->bqd"}> : () -> ()
    %cst_21 = arith.constant dense<0.000000e+00> : vector<4x16x32xf32>
    %49 = tpu.matmul %48, %35, %cst_21 {dimension_numbers = #tpu.dot_dimension_numbers<[2], [1], [1], [2], [0, 0, 0, 1, 1, 2], [0], [0]>} : vector<4x16x16xf32>, vector<4x16x32xf32>, vector<4x16x32xf32> -> vector<4x16x32xf32>
    "tpu.trace_stop"() : () -> ()
    %50 = vector.extract_strided_slice %26 {offsets = [0, 0], sizes = [64, 32], strides = [1, 1]} : vector<128x32xf32> to vector<64x32xf32>
    %51 = vector.shape_cast %50 : vector<64x32xf32> to vector<4x16x32xf32>
    %52 = arith.addf %51, %49 : vector<4x16x32xf32>
    %c0_22 = arith.constant 0 : index
    %c0_23 = arith.constant 0 : index
    %c0_24 = arith.constant 0 : index
    %53 = vector.load %arg7[%c0_22, %c0_23, %c0_24] : memref<4x16x32xf32, #tpu.memory_space<vmem>>, vector<4x16x32xf32>
    tpu.vector_store %arg7[%c0_22, %c0_23, %c0_24], %52 {strides = array<i32>} : memref<4x16x32xf32, #tpu.memory_space<vmem>>, vector<4x16x32xf32>,
    return
  }
  func.func @transform_0(%arg0: i32) -> (i32, i32, i32) {
    %c0_i32 = arith.constant 0 : i32
    %c0_i32_0 = arith.constant 0 : i32
    %c0_i32_1 = arith.constant 0 : i32
    return %arg0, %c0_i32, %c0_i32_0 : i32, i32, i32
  }
  func.func @transform_1(%arg0: i32) -> (i32, i32, i32) {
    %c0_i32 = arith.constant 0 : i32
    %c0_i32_0 = arith.constant 0 : i32
    %c0_i32_1 = arith.constant 0 : i32
    return %arg0, %c0_i32, %c0_i32_0 : i32, i32, i32
  }
  func.func @transform_2(%arg0: i32) -> (i32, i32) {
    %c0_i32 = arith.constant 0 : i32
    %c0_i32_0 = arith.constant 0 : i32
    %c0_i32_1 = arith.constant 0 : i32
    return %c0_i32, %c0_i32_0 : i32, i32
  }
  func.func @transform_3(%arg0: i32) -> (i32, i32) {
    %c0_i32 = arith.constant 0 : i32
    %c0_i32_0 = arith.constant 0 : i32
    %c0_i32_1 = arith.constant 0 : i32
    return %c0_i32, %c0_i32_0 : i32, i32
  }
  func.func @transform_4(%arg0: i32) -> (i32, i32) {
    %c0_i32 = arith.constant 0 : i32
    %c0_i32_0 = arith.constant 0 : i32
    %c0_i32_1 = arith.constant 0 : i32
    return %c0_i32, %c0_i32_0 : i32, i32
  }
  func.func @transform_5(%arg0: i32) -> (i32, i32) {
    %c0_i32 = arith.constant 0 : i32
    %c0_i32_0 = arith.constant 0 : i32
    %c0_i32_1 = arith.constant 0 : i32
    return %c0_i32, %c0_i32_0 : i32, i32
  }
  func.func @transform_6(%arg0: i32) -> (i32, i32, i32) {
    %c0_i32 = arith.constant 0 : i32
    %c0_i32_0 = arith.constant 0 : i32
    %c0_i32_1 = arith.constant 0 : i32
    return %arg0, %c0_i32, %c0_i32_0 : i32, i32, i32
  }
}

</mosaic_0001>

<bundles_post_ra>
// kernel: cross_attention.1
= control target key start
LH: loop header
LB: loop body
LE: loop exit
PB: predicated region body
PF: predicated region fallthrough
CT: control target
= control target key end

     0   :  { %s3010_s0 = inlined_call_operand.hbm [shape: f32[8,16,32], index: 0, kind: input, shape index: {}]   ;;  %s3011_s1 = inlined_call_operand.hbm [shape: f32[8,16,32], index: 1, kind: input, shape index: {}]   ;;  %s3012_s2 = inlined_call_operand.vmem [shape: f32[1,32], index: 2, kind: input, shape index: {}]   ;;  %s3013_s3 = inlined_call_operand.vmem [shape: f32[1,32], index: 3, kind: input, shape index: {}]   ;;  %s3014_s4 = inlined_call_operand.hbm [shape: f32[32,96], index: 4, kind: input, shape index: {}]   ;;  %s3015_s5 = inlined_call_operand.vmem [shape: f32[1,96], index: 5, kind: input, shape index: {}]   ;;  %s3016_s6 = inlined_call_operand.hbm [shape: f32[8,16,32], index: 6, kind: output, shape index: {}]  }
   0x1   :  { %3027 = sst [smem:[#allocation16_spill]] %s3010_s0 }
   0x2   :  { %3028 = sst [smem:[#allocation17_spill]] %s3014_s4 }
   0x3   :  { %11 = vsyncpa [#allocation3], 0 }
   0x4   :  { %13 = vsyncpa [#allocation3 + $0x1], 0 }
   0x5   :  { %14 = vsyncpa [#allocation6], 0 }
   0x6   :  { %16 = vsyncpa [#allocation6 + $0x1], 0 }
   0x7   :  { %17 = vsyncpa [#allocation4], 0 }
   0x8   :  { %19 = vsyncpa [#allocation4 + $0x1], 0  ;;  %s2383_s21 = smov 0   ;;  %s2385_s22 = smov 0  }
   0x9   :  { %s2387_s23 = smov 0   ;;  %s2389_s24 = smov 0  }
   0xa LB: > { %3029 = sst [smem:[#allocation13_spill]] %s2332_s23  ;;  %s2404_s25 = sadd.s32 4294967295, %s2336_s24   ;;  %s2336_s24 = sphi %s2389_s24, %s3051_s24   ;;  %s2332_s23 = sphi %s2387_s23, %s3053_s23   ;;  %s2328_s22 = sphi %s2385_s22, %s3055_s22   ;;  %s2324_s21 = sphi %s2383_s21, %s3054_s21  }
   0xb   : > { %s1742_s26 = sadd.s32 4294967294, %s2336_s24   ;;  %p45_p0 = scmp.ne.s32.totalorder %s2328_s22, %s2324_s21 }
   0xc   : > { %p3017_p1 = scmp.eq.s32.totalorder %s2404_s25, 0  ;;  %p185_p3 = scmp.eq.s32.totalorder %s1742_s26, 1 }
   0xd   : > { %p1743_p5 = scmp.ge.s32.totalorder %s2336_s24, 1  ;;  %p192_p7 = scmp.lt.s32.totalorder %s2336_s24, 3 }
   0xe   : > { %p2413_p4 = por %p3017_p1, %p45_p0  ;;  %p2418_p6 = por %p185_p3, %p45_p0 }
   0xf   : > { %p2423_p8 = pnand %p1743_p5, %p192_p7  ;;  %s2338_s30 = smov [#allocation7]  }
  0x10   : > { %s3030_s27 = scalar_select %p2413_p4, 1, 0 }
  0x11   : > { %s3031_s28 = scalar_select %p2418_p6, 1, 0 }
  0x12   : > { %s3032_s29 = scalar_select %p2423_p8, 1, 0 }
  0x13   : > { %s210_s7 = sshll.u32 %s2338_s30, 4  ;;  %p2012_p9 = pneg %p2423_p8  ;;  %s2427_s7 = int_to_ptr.vmem [resolvable:$true] %s210_s7 }
  0x14   : > { %s2439_s9 = sadd.s32 1, %s2336_s24   ;;  %s32_s10 = sadd.s32 1, %s2332_s23 }
  0x15   : > { %p2434_p11 = pnand %p2012_p9, %p3017_p1  ;;  %3034 = sst [smem:[#allocation14_spill]] %s2439_s9 }
  0x16   : > { %s29_s11 = ssub.s32 %s2336_s24, %s2439_s9  ;;  %s3035_s4 = sld [smem:[#allocation17_spill]] }
  0x17   : > { %p2176_p13 = pneg %p2434_p11 }
  0x1c   : > { %s2174_s14 = scalar_lea.hbm %s3035_s4, 512 }
  0x1d   : > { %p2175_p12 = scmp.ne.s32.totalorder %s3035_s4, %s2174_s14  ;;  %p2181_p5 = scmp.lt.u32.totalorder %s2174_s14, %s3035_s4 }
  0x1f   : > { %p2177_p0 = pnand %p2176_p13, %p2175_p12 }
  0x21   : > { %p2178_p3 = pneg %p2177_p0 }
  0x23   : > { %p2183_p7 = pnand %p2181_p5, %p2178_p3 }
  0x25   : > { %2186 = shalt.err (!%p2183_p7)
}
  0x26   : > { %s2187_s19 = scalar_lea.vmem %s2427_s7, 512  ;;  %p2195_p2 = scmp.lt.s32.totalorder %s2427_s7, %s2427_s7 }
  0x27   : > { %p2188_p9 = scmp.ne.s32.totalorder %s2427_s7, %s2187_s19  ;;  %p2196_p6 = scmp.lt.s32.totalorder %s2187_s19, %s2187_s19 }
  0x29   : > { %p2190_p10 = pnand %p2188_p9, %p2176_p13  ;;  %p2197_p4 = por %p2196_p6, %p2195_p2 }
  0x2b   : > { %p2191_p1 = pneg %p2190_p10 }
  0x2d   : > { %p2198_p8 = pnand %p2197_p4, %p2191_p1 }
  0x2f   : > { %2201 = shalt.err (!%p2198_p8)
}
  0x30   : > { %s3020_s20 = smov 128   ;;  %s3022_s26 = smov 8  }
  0x31   : > { %2015 = dma.hbm_to_vmem [thread:$0]  (!%p2434_p11), %s3035_s4, 512, %s2427_s7, [#allocation6], %s3020_s20, %s3020_s20, %s3022_s26  }
  0x32   : > { %p30_p1 = scmp.eq.s32.totalorder %s29_s11, 0  ;;  %p39_p2 = scmp.ne.s32.totalorder %s2332_s23, %s2328_s22 }
  0x33   : > { %p40_p4 = scmp.eq.s32.totalorder %s2336_s24, 0  ;;  %p2028_p6 = scmp.lt.s32.totalorder %s2336_s24, 2 }
  0x34   : > { %s2473_s13 = scalar_select %p30_p1, %s2332_s23, %s32_s10  }
  0x35   : > { %p41_p8 = por %p40_p4, %p39_p2  ;;  %p3037_p10 = scmp.eq.s32.totalorder %s2404_s25, 1 }
  0x36   : > { %3036 = sst [smem:[#allocation15_spill]] %s2473_s13  ;;  %s227_s8 = sand.u32 1, %s2332_s23  }
  0x37   : > { %p2477_p12 = por %p3037_p10, %p39_p2  ;;  %s1809_s15 = sshll.u32 %s2336_s24, 10 }
  0x38   : > { %s2483_s16 = sshll.u32 %s227_s8, 6  ;;  %s3039_s0 = sld [smem:[#allocation16_spill]] }
  0x39   : > { %s231_s10 = scalar_lea.vmem [#allocation2], %s2483_s16  ;;  %p2491_p11 = pnand %p2028_p6, %p41_p8 }
  0x3a   : > { %s239_s11 = sshll.u32 %s231_s10, 4  ;;  %s2500_s17 = scalar_lea.hbm %s3011_s1, %s1809_s15  ;;  %s2495_s11 = int_to_ptr.vmem [resolvable:$true] %s239_s11 }
  0x3b   : > { %s2502_s18 = scalar_lea.sflag [#allocation3], %s227_s8  ;;  %p2204_p0 = pneg %p2491_p11 }
  0x3e   : > { %s2488_s7 = scalar_lea.hbm %s3039_s0, %s1809_s15  ;;  %s2207_s4 = scalar_lea.hbm %s3039_s0, 2048 }
  0x3f   : > { %s2202_s20 = scalar_lea.hbm %s2488_s7, 1024  ;;  %p2208_p7 = scmp.lt.u32.totalorder %s2488_s7, %s3039_s0 }
  0x40   : > { %p2203_p13 = scmp.ne.s32.totalorder %s2488_s7, %s2202_s20  ;;  %p2209_p9 = scmp.lt.u32.totalorder %s2207_s4, %s2202_s20 }
  0x41   : > { %p2211_p2 = scmp.lt.u32.totalorder %s2202_s20, %s2488_s7 }
  0x42   : > { %p2205_p3 = pnand %p2204_p0, %p2203_p13  ;;  %p2210_p1 = por %p2209_p9, %p2208_p7 }
  0x44   : > { %p2206_p5 = pneg %p2205_p3  ;;  %p2212_p4 = por %p2211_p2, %p2210_p1 }
  0x46   : > { %p2213_p6 = pnand %p2212_p4, %p2206_p5 }
  0x48   : > { %2216 = shalt.err (!%p2213_p6)
}
  0x49   : > { %s2217_s8 = scalar_lea.vmem %s2495_s11, 1024  ;;  %s2341_s26 = smov [#allocation2]  }
  0x4a   : > { %p2218_p8 = scmp.ne.s32.totalorder %s2495_s11, %s2217_s8  ;;  %s2222_s15 = sshll.u32 %s2341_s26, 4  ;;  %s2223_s15 = int_to_ptr.vmem [resolvable:$false] %s2222_s15 }
  0x4b   : > { %s2224_s23 = scalar_lea.vmem %s2223_s15, 2048  ;;  %p2225_p3 = scmp.lt.s32.totalorder %s2495_s11, %s2223_s15 }
  0x4c   : > { %p2220_p10 = pnand %p2218_p8, %p2204_p0  ;;  %p2226_p7 = scmp.lt.s32.totalorder %s2224_s23, %s2217_s8 }
  0x4e   : > { %p2221_p13 = pneg %p2220_p10  ;;  %p2227_p9 = por %p2226_p7, %p2225_p3 }
  0x50   : > { %p2228_p1 = pnand %p2227_p9, %p2221_p13 }
  0x52   : > { %2231 = shalt.err (!%p2228_p1)
}
  0x53   : > { %s3041_s4 = smov 8   ;;  %s3042_s20 = smov 128  }
  0x54   : > { %2019 = dma.hbm_to_vmem [thread:$0]  (!%p2491_p11), %s2488_s7, 1024, %s2495_s11, %s2502_s18, %s3042_s20, %s3042_s20, %s3041_s4  }
  0x55   : > { %s253_s13 = scalar_lea.vmem [#allocation5], %s2483_s16  ;;  %s249_s12 = sand.u32 1, %s2336_s24  }
  0x56   : > { %s261_s30 = sshll.u32 %s253_s13, 4  ;;  %s2537_s10 = scalar_lea.sflag [#allocation6], %s249_s12  ;;  %s2535_s30 = int_to_ptr.vmem [resolvable:$true] %s261_s30 }
  0x57   : > { %s2232_s8 = scalar_lea.hbm %s2500_s17, 1024  ;;  %s2237_s23 = scalar_lea.hbm %s3011_s1, 2048 }
  0x58   : > { %p2233_p5 = scmp.ne.s32.totalorder %s2500_s17, %s2232_s8  ;;  %p2238_p6 = scmp.lt.u32.totalorder %s2500_s17, %s3011_s1 }
  0x59   : > { %p2239_p8 = scmp.lt.u32.totalorder %s2237_s23, %s2232_s8  ;;  %p2241_p13 = scmp.lt.u32.totalorder %s2232_s8, %s2500_s17 }
  0x5a   : > { %p2235_p2 = pnand %p2233_p5, %p2204_p0 }
  0x5b   : > { %p2240_p10 = por %p2239_p8, %p2238_p6 }
  0x5c   : > { %p2236_p4 = pneg %p2235_p2 }
  0x5d   : > { %p2242_p3 = por %p2241_p13, %p2240_p10 }
  0x5f   : > { %p2243_p7 = pnand %p2242_p3, %p2236_p4 }
  0x61   : > { %2246 = shalt.err (!%p2243_p7)
}
  0x62   : > { %s2247_s16 = scalar_lea.vmem %s2535_s30, 1024  ;;  %s2342_s7 = smov [#allocation5]  }
  0x63   : > { %p2248_p9 = scmp.ne.s32.totalorder %s2535_s30, %s2247_s16  ;;  %s2252_s11 = sshll.u32 %s2342_s7, 4  ;;  %s2253_s11 = int_to_ptr.vmem [resolvable:$false] %s2252_s11 }
  0x64   : > { %s2254_s0 = scalar_lea.vmem %s2253_s11, 2048  ;;  %p2255_p2 = scmp.lt.s32.totalorder %s2535_s30, %s2253_s11 }
  0x65   : > { %p2250_p1 = pnand %p2248_p9, %p2204_p0  ;;  %p2256_p6 = scmp.lt.s32.totalorder %s2254_s0, %s2247_s16 }
  0x67   : > { %p2251_p5 = pneg %p2250_p1  ;;  %p2257_p8 = por %p2256_p6, %p2255_p2 }
  0x69   : > { %p2258_p10 = pnand %p2257_p8, %p2251_p5 }
  0x6b   : > { %2261 = shalt.err (!%p2258_p10)
}
  0x6c   : > { %2022 = dma.hbm_to_vmem [thread:$0]  (!%p2491_p11), %s2500_s17, 1024, %s2535_s30, %s2537_s10, %s3042_s20, %s3042_s20, %s3041_s4  }
  0x6d   : > { %p3043_p0 = scmp.ne.s32.totalorder %s3032_s29, 0 }
  0x6e   : > { %s2569_s9 = sand.u32 (!%p3043_p0), 1, %s2328_s22   ;;  %p3044_p4 = scmp.ne.s32.totalorder (!%p3043_p0), %s3030_s27, 0 }
  0x6f   : > { %273 = sbr.rel (%p3043_p0) target bundleno = 1633 (0x661), region = 44  ;;  %s2572_s18 = sshll.u32 (!%p3043_p0), %s2569_s9, 6 }
  0x70   : > { %s276_s19 = scalar_lea.sflag (!%p3043_p0), [#allocation3], %s2569_s9  ;;  %s279_s13 = scalar_lea.vmem (!%p3043_p0), [#allocation2], %s2572_s18 }
  0x76   : > { %2307 = dma.done.wait (%p3044_p4), %s276_s19, 1024  }
  0x77   : > { %2309 = vsyncadd (%p3044_p4), %s276_s19, 4294966272  ;;  %s284_s29 = sand.u32 1, %s2404_s25   ;;  %s2582_s4 = scalar_lea.vmem [#allocation5], %s2572_s18 }
  0x78   : > { %s285_s17 = scalar_lea.sflag [#allocation6], %s284_s29 }
  0x79   : > { %2311 = dma.done.wait (%p3044_p4), %s285_s17, 1024  }
  0x7a   : > { %2313 = vsyncadd (%p3044_p4), %s285_s17, 4294966272  ;;  %p3045_p11 = scmp.eq.s32.totalorder %s2404_s25, 0 }
  0x7c   : > { %2315 = dma.done.wait (%p3045_p11), [#allocation6], 512   ;;  %p3046_p13 = pmov %p3045_p11 }
  0x7d   : > { %vm347_vm0 = vcmask 261120   ;;  %v331_v0 = vld [vmem:[%s279_s13] sm:$0xff]  ;;  %v333_v1 = vld [vmem:[%s279_s13 + $0x10] sm:$0xff]  ;;  %v332_v2 = vld [vmem:[%s279_s13 + $0x8] sm:$0xff]  ;;  %s2343_s26 = smov 64   ;;  %vm1169_vm2 = vcmask 130048  }
  0x7e   : > { %2317 = vsyncadd (%p3046_p13), [#allocation6], 4294966784  ;;  %v348_v3 = vsel %vm347_vm0, %v331_v0, 0.0  ;;  %v354_v4 = vsel %vm347_vm0, %v333_v1, 0.0  ;;  %v334_v5 = vld [vmem:[%s279_s13 + $0x18] sm:$0xff]  ;;  %v351_v6 = vsel %vm347_vm0, %v332_v2, 0.0 }
  0x7f   : > { %349 = vadd.xlane.f32.xlu0 %v348_v3  ;;  %355 = vadd.xlane.f32.xlu1 %v354_v4  ;;  %v357_v7 = vsel %vm347_vm0, %v334_v5, 0.0  ;;  %v335_v8 = vld [vmem:[%s279_s13 + $0x20] sm:$0xff]  ;;  %v336_v9 = vld [vmem:[%s279_s13 + $0x28] sm:$0xff]  ;;  %v2598_v12 = vld [vmem:[%s279_s13 + $0x30] sm:$0xff]  ;;  %s2344_s15 = smov 96   ;;  %s325_s23 = scalar_lea.vmem [#allocation8], %s2572_s18 }
  0x80   : > { %v360_v10 = vsel %vm347_vm0, %v335_v8, 0.0  ;;  %v363_v11 = vsel %vm347_vm0, %v336_v9, 0.0  ;;  %v2600_v13 = vld [vmem:[%s279_s13 + $0x38] sm:$0xff]  ;;  %v366_v14 = vsel %vm347_vm0, %v2598_v12, 0.0  ;;  %v2607_v16 = vld [vmem:[%s2582_s4] sm:$0xff]  ;;  %v2610_v17 = vld [vmem:[%s2582_s4 + $0x8] sm:$0xff] }
  0x81   : > { %v369_v15 = vsel %vm347_vm0, %v2600_v13, 0.0  ;;  %v372_v18 = vsel %vm347_vm0, %v2607_v16, 0.0  ;;  %v375_v19 = vsel %vm347_vm0, %v2610_v17, 0.0  ;;  %v2617_v20 = vld [vmem:[%s2582_s4 + $0x10] sm:$0xff]  ;;  %v2620_v21 = vld [vmem:[%s2582_s4 + $0x18] sm:$0xff]  ;;  %v2627_v24 = vld [vmem:[%s2582_s4 + $0x20] sm:$0xff] }
  0x82   : > { %v378_v22 = vsel %vm347_vm0, %v2617_v20, 0.0  ;;  %v381_v23 = vsel %vm347_vm0, %v2620_v21, 0.0  ;;  %v2630_v25 = vld [vmem:[%s2582_s4 + $0x28] sm:$0xff]  ;;  %v384_v26 = vsel %vm347_vm0, %v2627_v24, 0.0  ;;  %v2637_v28 = vld [vmem:[%s2582_s4 + $0x30] sm:$0xff]  ;;  %v2640_v29 = vld [vmem:[%s2582_s4 + $0x38] sm:$0xff] }
  0x83   : > { %352 = vadd.xlane.f32.xlu0 %v351_v6  ;;  %358 = vadd.xlane.f32.xlu1 %v357_v7  ;;  %v387_v27 = vsel %vm347_vm0, %v2630_v25, 0.0  ;;  %v390_v30 = vsel %vm347_vm0, %v2637_v28, 0.0  ;;  %v393_v31 = vsel %vm347_vm0, %v2640_v29, 0.0  ;;  %vm2857_vm1 = vmpackc.low %vm347_vm0, %vm347_vm0  ;;  %s1813_s16 = sshll.u32 %s2404_s25, 10  ;;  %s1637_s7 = sshll.u32 %s325_s23, 4  ;;  %s2963_s7 = int_to_ptr.vmem [resolvable:$true] %s1637_s7 }
  0x84   : > { %s2961_s18 = scalar_lea.hbm %s3016_s6, %s1813_s16  ;;  %s1623_s25 = scalar_lea.sflag [#allocation4], %s2569_s9 }
  0x85   : > { %s2262_s19 = scalar_lea.vmem %s2963_s7, 1024  ;;  %s2345_s13 = smov [#allocation8]  }
  0x86   : > { %p2263_p3 = scmp.ne.s32.totalorder %s2963_s7, %s2262_s19  ;;  %s2266_s29 = sshll.u32 %s2345_s13, 4  ;;  %s2267_s29 = int_to_ptr.vmem [resolvable:$false] %s2266_s29 }
  0x87   : > { %361 = vadd.xlane.f32.xlu0 %v360_v10  ;;  %364 = vadd.xlane.f32.xlu1 %v363_v11  ;;  %s2268_s17 = scalar_lea.vmem %s2267_s29, 2048  ;;  %p2269_p1 = scmp.lt.s32.totalorder %s2963_s7, %s2267_s29 }
  0x88   : > { %p2264_p7 = pnand %p2263_p3, %p2477_p12  ;;  %p2270_p5 = scmp.lt.s32.totalorder %s2268_s17, %s2262_s19 }
  0x8a   : > { %p2265_p9 = pneg %p2264_p7  ;;  %p2271_p2 = por %p2270_p5, %p2269_p1 }
  0x8b   : > { %367 = vadd.xlane.f32.xlu0 %v366_v14  ;;  %370 = vadd.xlane.f32.xlu1 %v369_v15 }
  0x8c   : > { %p2272_p6 = pnand %p2271_p2, %p2265_p9 }
  0x8f   : > { %373 = vadd.xlane.f32.xlu0 %v372_v18  ;;  %376 = vadd.xlane.f32.xlu1 %v375_v19 }
  0x93   : > { %379 = vadd.xlane.f32.xlu0 %v378_v22  ;;  %382 = vadd.xlane.f32.xlu1 %v381_v23 }
  0x97   : > { %385 = vadd.xlane.f32.xlu0 %v384_v26  ;;  %388 = vadd.xlane.f32.xlu1 %v387_v27 }
  0x9b   : > { %391 = vadd.xlane.f32.xlu0 %v390_v30  ;;  %394 = vadd.xlane.f32.xlu1 %v393_v31 }
 0x10c   : > { %v350_v32 = vpop.xlane.xlu0 %349  ;;  %v356_v33 = vpop.xlane.xlu1 %355 }
 0x10d   : > { %v397_v34 = vmul.f32 0.03125, %v350_v32  ;;  %v399_v35 = vmul.f32 0.03125, %v356_v33 }
 0x10f   : > { %v2646_v36 = vsub.f32 %v331_v0, %v397_v34  ;;  %v2648_v37 = vsub.f32 %v333_v1, %v399_v35 }
 0x110   : > { %v353_v38 = vpop.xlane.xlu0 %352  ;;  %v359_v39 = vpop.xlane.xlu1 %358 }
 0x111   : > { %v398_v40 = vmul.f32 0.03125, %v353_v38  ;;  %v400_v41 = vmul.f32 0.03125, %v359_v39  ;;  %v429_v42 = vmul.f32 %v2646_v36, %v2646_v36  ;;  %v431_v43 = vmul.f32 %v2648_v37, %v2648_v37 }
 0x113   : > { %v2654_v44 = vsub.f32 %v332_v2, %v398_v40  ;;  %v2656_v45 = vsub.f32 %v334_v5, %v400_v41  ;;  %v445_v46 = vsel %vm347_vm0, %v429_v42, 0.0  ;;  %v451_v49 = vsel %vm347_vm0, %v431_v43, 0.0 }
 0x114   : > { %446 = vadd.xlane.f32.xlu0 %v445_v46  ;;  %v362_v47 = vpop.xlane.xlu0 %361  ;;  %v365_v48 = vpop.xlane.xlu1 %364 }
 0x115   : > { %v401_v50 = vmul.f32 0.03125, %v362_v47  ;;  %v402_v51 = vmul.f32 0.03125, %v365_v48  ;;  %v430_v52 = vmul.f32 %v2654_v44, %v2654_v44  ;;  %v432_v53 = vmul.f32 %v2656_v45, %v2656_v45 }
 0x117   : > { %v2664_v54 = vsub.f32 %v335_v8, %v401_v50  ;;  %v2666_v55 = vsub.f32 %v336_v9, %v402_v51  ;;  %v448_v56 = vsel %vm347_vm0, %v430_v52, 0.0  ;;  %v454_v59 = vsel %vm347_vm0, %v432_v53, 0.0  ;;  %v602_v53 = vld [vmem:[#allocation7 + $0x8] sm:$0xff] }
 0x118   : > { %452 = vadd.xlane.f32.xlu0 %v451_v49  ;;  %449 = vadd.xlane.f32.xlu1 %v448_v56  ;;  %v368_v57 = vpop.xlane.xlu0 %367  ;;  %v371_v58 = vpop.xlane.xlu1 %370 }
 0x119   : > { %v403_v60 = vmul.f32 0.03125, %v368_v57  ;;  %v404_v61 = vmul.f32 0.03125, %v371_v58  ;;  %v433_v62 = vmul.f32 %v2664_v54, %v2664_v54  ;;  %v434_v63 = vmul.f32 %v2666_v55, %v2666_v55  ;;  %v603_v57 = vld [vmem:[#allocation7 + $0x10] sm:$0xff]  ;;  %v604_v58 = vld [vmem:[#allocation7 + $0x18] sm:$0xff] }
 0x11b   : > { %v2675_v0 = vsub.f32 %v2598_v12, %v403_v60  ;;  %v2678_v1 = vsub.f32 %v2600_v13, %v404_v61  ;;  %v457_v2 = vsel %vm347_vm0, %v433_v62, 0.0  ;;  %v460_v5 = vsel %vm347_vm0, %v434_v63, 0.0 }
 0x11c   : > { %455 = vadd.xlane.f32.xlu1 %v454_v59  ;;  %458 = vadd.xlane.f32.xlu0 %v457_v2  ;;  %v374_v3 = vpop.xlane.xlu0 %373  ;;  %v377_v4 = vpop.xlane.xlu1 %376  ;;  %v1958_v59 = vpack.c.bf16 %v604_v58, %v603_v57 }
 0x11d   : > { %v405_v6 = vmul.f32 0.03125, %v374_v3  ;;  %v406_v7 = vmul.f32 0.03125, %v377_v4  ;;  %v435_v8 = vmul.f32 %v2675_v0, %v2675_v0  ;;  %v436_v9 = vmul.f32 %v2678_v1, %v2678_v1 }
 0x11f   : > { %v2687_v10 = vsub.f32 %v2607_v16, %v405_v6  ;;  %v2690_v11 = vsub.f32 %v2610_v17, %v406_v7  ;;  %v463_v12 = vsel %vm347_vm0, %v435_v8, 0.0  ;;  %v466_v15 = vsel %vm347_vm0, %v436_v9, 0.0 }
 0x120   : > { %461 = vadd.xlane.f32.xlu1 %v460_v5  ;;  %464 = vadd.xlane.f32.xlu0 %v463_v12  ;;  %v380_v13 = vpop.xlane.xlu0 %379  ;;  %v383_v14 = vpop.xlane.xlu1 %382 }
 0x121   : > { %v407_v18 = vmul.f32 0.03125, %v380_v13  ;;  %v408_v19 = vmul.f32 0.03125, %v383_v14  ;;  %v437_v22 = vmul.f32 %v2687_v10, %v2687_v10  ;;  %v438_v16 = vmul.f32 %v2690_v11, %v2690_v11 }
 0x123   : > { %v2699_v23 = vsub.f32 %v2617_v20, %v407_v18  ;;  %v2702_v17 = vsub.f32 %v2620_v21, %v408_v19  ;;  %v469_v26 = vsel %vm347_vm0, %v437_v22, 0.0  ;;  %v472_v31 = vsel %vm347_vm0, %v438_v16, 0.0 }
 0x124   : > { %467 = vadd.xlane.f32.xlu1 %v466_v15  ;;  %470 = vadd.xlane.f32.xlu0 %v469_v26  ;;  %v386_v27 = vpop.xlane.xlu0 %385  ;;  %v389_v30 = vpop.xlane.xlu1 %388 }
 0x125   : > { %v409_v32 = vmul.f32 0.03125, %v386_v27  ;;  %v410_v33 = vmul.f32 0.03125, %v389_v30  ;;  %v439_v34 = vmul.f32 %v2699_v23, %v2699_v23  ;;  %v440_v20 = vmul.f32 %v2702_v17, %v2702_v17  ;;  %v2739_v30 = vld [vmem:[%s3012_s2] ss:$0 sm:$0xff] }
 0x127   : > { %v2711_v35 = vsub.f32 %v2627_v24, %v409_v32  ;;  %v2714_v21 = vsub.f32 %v2630_v25, %v410_v33  ;;  %v475_v38 = vsel %vm347_vm0, %v439_v34, 0.0  ;;  %v478_v41 = vsel %vm347_vm0, %v440_v20, 0.0 }
 0x128   : > { %473 = vadd.xlane.f32.xlu1 %v472_v31  ;;  %476 = vadd.xlane.f32.xlu0 %v475_v38  ;;  %v392_v39 = vpop.xlane.xlu0 %391  ;;  %v395_v40 = vpop.xlane.xlu1 %394  ;;  %v2745_v38 = vld [vmem:[%s3013_s3] ss:$0 sm:$0xff] }
 0x129   : > { %v411_v42 = vmul.f32 0.03125, %v392_v39  ;;  %v412_v43 = vmul.f32 0.03125, %v395_v40  ;;  %v441_v46 = vmul.f32 %v2711_v35, %v2711_v35  ;;  %v442_v24 = vmul.f32 %v2714_v21, %v2714_v21 }
 0x12b   : > { %v2723_v47 = vsub.f32 %v2637_v28, %v411_v42  ;;  %v2726_v25 = vsub.f32 %v2640_v29, %v412_v43  ;;  %v481_v48 = vsel %vm347_vm0, %v441_v46, 0.0  ;;  %v484_v49 = vsel %vm347_vm0, %v442_v24, 0.0  ;;  %v601_v29 = vld [vmem:[#allocation7] sm:$0xff] }
 0x12c   : > { %479 = vadd.xlane.f32.xlu1 %v478_v41  ;;  %482 = vadd.xlane.f32.xlu0 %v481_v48  ;;  %v1954_v56 = vpack.c.bf16 %v602_v53, %v601_v29 }
 0x12d   : > { %v443_v50 = vmul.f32 %v2723_v47, %v2723_v47  ;;  %v444_v51 = vmul.f32 %v2726_v25, %v2726_v25 }
 0x12e   : > { %1955 = vmatprep.subr.bf16.mxu0 %v1954_v56 }
 0x12f   : > { %v487_v52 = vsel %vm347_vm0, %v443_v50, 0.0  ;;  %v490_v28 = vsel %vm347_vm0, %v444_v51, 0.0  ;;  %1957 = vmatpush3.bf16.msra.mxu0 %v1954_v56 }
 0x130   : > { %485 = vadd.xlane.f32.xlu1 %v484_v49  ;;  %488 = vadd.xlane.f32.xlu0 %v487_v52 }
 0x131   : > { %1959 = vmatprep.subr.bf16.mxu0 %v1958_v59 }
 0x133   : > { %1961 = vmatpush3.bf16.msra.mxu0 %v1958_v59 }
 0x134   : > { %491 = vadd.xlane.f32.xlu1 %v490_v28 }
 0x1a1   : > { %v447_v60 = vpop.xlane.xlu0 %446 }
 0x1a2   : > { %v493_v61 = vmul.f32 0.03125, %v447_v60 }
 0x1a4   : > { %v509_v62 = vadd.f32 1e-05, %v493_v61 }
 0x1a5   : > { %v450_v63 = vpop.xlane.xlu1 %449  ;;  %v453_v2 = vpop.xlane.xlu0 %452 }
 0x1a6   : > { %2110 = vrsqrt.f32 %v509_v62  ;;  %v494_v3 = vmul.f32 0.03125, %v450_v63  ;;  %v495_v4 = vmul.f32 0.03125, %v453_v2 }
 0x1a8   : > { %v510_v5 = vadd.f32 1e-05, %v494_v3  ;;  %v511_v6 = vadd.f32 1e-05, %v495_v4 }
 0x1a9   : > { %v456_v7 = vpop.xlane.xlu1 %455  ;;  %v459_v8 = vpop.xlane.xlu0 %458 }
 0x1aa   : > { %2112 = vrsqrt.f32 %v510_v5  ;;  %v496_v9 = vmul.f32 0.03125, %v456_v7  ;;  %v497_v12 = vmul.f32 0.03125, %v459_v8 }
 0x1ab   : > { %2114 = vrsqrt.f32 %v511_v6 }
 0x1ac   : > { %v512_v13 = vadd.f32 1e-05, %v496_v9  ;;  %v513_v14 = vadd.f32 1e-05, %v497_v12 }
 0x1ad   : > { %v462_v15 = vpop.xlane.xlu1 %461  ;;  %v465_v18 = vpop.xlane.xlu0 %464 }
 0x1ae   : > { %2116 = vrsqrt.f32 %v512_v13  ;;  %v498_v19 = vmul.f32 0.03125, %v462_v15  ;;  %v499_v22 = vmul.f32 0.03125, %v465_v18 }
 0x1af   : > { %2118 = vrsqrt.f32 %v513_v14 }
 0x1b0   : > { %v2111_v16 = vpop.eup %2110  ;;  %v514_v26 = vadd.f32 1e-05, %v498_v19  ;;  %v515_v27 = vadd.f32 1e-05, %v499_v22 }
 0x1b1   : > { %v468_v31 = vpop.xlane.xlu1 %467  ;;  %v471_v32 = vpop.xlane.xlu0 %470  ;;  %v541_v33 = vmul.f32 %v2111_v16, %v2646_v36 }
 0x1b2   : > { %2120 = vrsqrt.f32 %v514_v26  ;;  %v500_v34 = vmul.f32 0.03125, %v468_v31  ;;  %v501_v20 = vmul.f32 0.03125, %v471_v32 }
 0x1b3   : > { %2122 = vrsqrt.f32 %v515_v27  ;;  %v563_v39 = vmul.f32 %v2739_v30, %v541_v33 }
 0x1b4   : > { %v2113_v40 = vpop.eup %2112  ;;  %v516_v41 = vadd.f32 1e-05, %v500_v34  ;;  %v517_v42 = vadd.f32 1e-05, %v501_v20 }
 0x1b5   : > { %v2115_v43 = vpop.eup %2114  ;;  %v474_v46 = vpop.xlane.xlu1 %473  ;;  %v2749_v48 = vadd.f32 %v2745_v38, %v563_v39  ;;  %v542_v36 = vmul.f32 %v2113_v40, %v2654_v44 }
 0x1b6   : > { %v477_v24 = vpop.xlane.xlu0 %476  ;;  %2124 = vrsqrt.f32 %v516_v41  ;;  %v502_v49 = vmul.f32 0.03125, %v474_v46  ;;  %v543_v51 = vmul.f32 %v2115_v43, %v2648_v37 }
 0x1b7   : > { %v503_v50 = vmul.f32 0.03125, %v477_v24  ;;  %2126 = vrsqrt.f32 %v517_v42  ;;  %1874 = vmatprep.mubr.msk.f32.mxu0 %vm347_vm0, %v2749_v48  ;;  %v564_v52 = vmul.f32 %v2739_v30, %v542_v36 }
 0x1b8   : > { %v2117_v28 = vpop.eup %2116  ;;  %v518_v29 = vadd.f32 1e-05, %v502_v49  ;;  %v565_v56 = vmul.f32 %v2739_v30, %v543_v51 }
 0x1b9   : > { %v519_v53 = vadd.f32 1e-05, %v503_v50  ;;  %v2119_v57 = vpop.eup %2118  ;;  %v480_v58 = vpop.xlane.xlu1 %479  ;;  %v2758_v44 = vadd.f32 %v2745_v38, %v564_v52  ;;  %v544_v60 = vmul.f32 %v2117_v28, %v2656_v45 }
 0x1ba   : > { %v483_v59 = vpop.xlane.xlu0 %482  ;;  %2128 = vrsqrt.f32 %v518_v29  ;;  %v504_v37 = vmul.f32 0.03125, %v480_v58  ;;  %v2762_v62 = vadd.f32 %v2745_v38, %v565_v56  ;;  %v545_v2 = vmul.f32 %v2119_v57, %v2664_v54 }
 0x1bb   : > { %v505_v61 = vmul.f32 0.03125, %v483_v59  ;;  %2130 = vrsqrt.f32 %v519_v53  ;;  %1875 = vmatmul.mubr.msk.f32.vlgmr.msra.gmra.mrb[0].mxu0 %vm347_vm0, %v2758_v44  ;;  %v566_v63 = vmul.f32 %v2739_v30, %v544_v60 }
 0x1bc   : > { %v2121_v3 = vpop.eup %2120  ;;  %v520_v4 = vadd.f32 1e-05, %v504_v37  ;;  %1877 = vmatprep.mubr.msk.f32.mxu0 %vm347_vm0, %v2762_v62  ;;  %v567_v9 = vmul.f32 %v2739_v30, %v545_v2 }
 0x1bd   : > { %v521_v5 = vadd.f32 1e-05, %v505_v61  ;;  %v2123_v45 = vpop.eup %2122  ;;  %v486_v6 = vpop.xlane.xlu1 %485  ;;  %v2771_v8 = vadd.f32 %v2745_v38, %v566_v63  ;;  %v546_v12 = vmul.f32 %v2121_v3, %v2666_v55  ;;  %v1761_v3 = vld [vmem:[%s3015_s5] ss:$0 sm:$0xff] }
 0x1be   : > { %v489_v7 = vpop.xlane.xlu0 %488  ;;  %2132 = vrsqrt.f32 %v520_v4  ;;  %v506_v13 = vmul.f32 0.03125, %v486_v6  ;;  %v547_v54 = vmul.f32 %v2123_v45, %v2675_v0  ;;  %v2779_v15 = vadd.f32 %v2745_v38, %v567_v9 }
 0x1bf   : > { %v507_v14 = vmul.f32 0.03125, %v489_v7  ;;  %2134 = vrsqrt.f32 %v521_v5  ;;  %1878 = vmatmul.mubr.msk.f32.gmra.mrb[2].mxu0 %vm347_vm0, %v2771_v8  ;;  %v568_v18 = vmul.f32 %v2739_v30, %v546_v12 }
 0x1c0   : > { %v2125_v19 = vpop.eup %2124  ;;  %v522_v22 = vadd.f32 1e-05, %v506_v13  ;;  %v569_v26 = vmul.f32 %v2739_v30, %v547_v54  ;;  %1880 = vmatprep.mubr.msk.f32.mxu0 %vm347_vm0, %v2779_v15 }
 0x1c1   : > { %v523_v16 = vadd.f32 1e-05, %v507_v14  ;;  %v2127_v55 = vpop.eup %2126  ;;  %v492_v27 = vpop.xlane.xlu1 %491  ;;  %v2786_v0 = vadd.f32 %v2745_v38, %v568_v18  ;;  %v548_v31 = vmul.f32 %v2125_v19, %v2678_v1 }
 0x1c2   : > { %2136 = vrsqrt.f32 %v522_v22  ;;  %v508_v32 = vmul.f32 0.03125, %v492_v27  ;;  %v2790_v33 = vadd.f32 %v2745_v38, %v569_v26  ;;  %v549_v34 = vmul.f32 %v2127_v55, %v2687_v10 }
 0x1c3   : > { %2138 = vrsqrt.f32 %v523_v16  ;;  %1881 = vmatmul.mubr.msk.f32.gmra.mrb[4].mxu0 %vm347_vm0, %v2786_v0  ;;  %v570_v20 = vmul.f32 %v2739_v30, %v548_v31 }
 0x1c4   : > { %v2129_v39 = vpop.eup %2128  ;;  %v524_v40 = vadd.f32 1e-05, %v508_v32  ;;  %1883 = vmatprep.mubr.msk.f32.mxu0 %vm347_vm0, %v2790_v33  ;;  %v571_v1 = vmul.f32 %v2739_v30, %v549_v34 }
 0x1c5   : > { %v2131_v41 = vpop.eup %2130  ;;  %v2800_v42 = vadd.f32 %v2745_v38, %v570_v20  ;;  %v550_v43 = vmul.f32 %v2129_v39, %v2690_v11 }
 0x1c6   : > { %2140 = vrsqrt.f32 %v524_v40  ;;  %v593_v10 = vadd.f32 %v2745_v38, %v571_v1  ;;  %v551_v46 = vmul.f32 %v2131_v41, %v2699_v23 }
 0x1c7   : > { %1884 = vmatmul.mubr.msk.f32.gmra.mrb[6].mxu0 %vm347_vm0, %v2800_v42  ;;  %v572_v24 = vmul.f32 %v2739_v30, %v550_v43 }
 0x1c8   : > { %v2133_v36 = vpop.eup %2132  ;;  %1886 = vmatprep.mubr.msk.f32.mxu0 %vm347_vm0, %v593_v10  ;;  %v573_v49 = vmul.f32 %v2739_v30, %v551_v46 }
 0x1c9   : > { %v2135_v50 = vpop.eup %2134  ;;  %v594_v51 = vadd.f32 %v2745_v38, %v572_v24  ;;  %v552_v11 = vmul.f32 %v2133_v36, %v2702_v17 }
 0x1ca   : > { %v595_v52 = vadd.f32 %v2745_v38, %v573_v49  ;;  %v553_v28 = vmul.f32 %v2135_v50, %v2711_v35 }
 0x1cb   : > { %1887 = vmatmul.mubr.msk.f32.gmra.mrb[8].mxu0 %vm347_vm0, %v594_v51  ;;  %v574_v23 = vmul.f32 %v2739_v30, %v552_v11 }
 0x1cc   : > { %v2137_v29 = vpop.eup %2136  ;;  %1889 = vmatprep.mubr.msk.f32.mxu0 %vm347_vm0, %v595_v52  ;;  %v575_v53 = vmul.f32 %v2739_v30, %v553_v28 }
 0x1cd   : > { %v2139_v56 = vpop.eup %2138  ;;  %v596_v57 = vadd.f32 %v2745_v38, %v574_v23  ;;  %v554_v58 = vmul.f32 %v2137_v29, %v2714_v21 }
 0x1ce   : > { %v597_v17 = vadd.f32 %v2745_v38, %v575_v53  ;;  %v555_v59 = vmul.f32 %v2139_v56, %v2723_v47 }
 0x1cf   : > { %1890 = vmatmul.mubr.msk.f32.gmra.mrb[10].mxu0 %vm347_vm0, %v596_v57  ;;  %v576_v35 = vmul.f32 %v2739_v30, %v554_v58 }
 0x1d0   : > { %v2141_v60 = vpop.eup %2140  ;;  %1892 = vmatprep.mubr.msk.f32.mxu0 %vm347_vm0, %v597_v17  ;;  %v577_v37 = vmul.f32 %v2739_v30, %v555_v59 }
 0x1d1   : > { %v598_v61 = vadd.f32 %v2745_v38, %v576_v35  ;;  %v556_v63 = vmul.f32 %v2141_v60, %v2726_v25 }
 0x1d2   : > { %v599_v2 = vadd.f32 %v2745_v38, %v577_v37 }
 0x1d3   : > { %1893 = vmatmul.mubr.msk.f32.gmra.mrb[12].mxu0 %vm347_vm0, %v598_v61  ;;  %v578_v21 = vmul.f32 %v2739_v30, %v556_v63 }
 0x1d4   : > { %1895 = vmatprep.mubr.msk.f32.mxu0 %vm347_vm0, %v599_v2 }
 0x1d5   : > { %v600_v47 = vadd.f32 %v2745_v38, %v578_v21 }
 0x1d7   : > { %1896 = vmatmul.mubr.msk.f32.gmra.mrb[14].mxu0 %vm347_vm0, %v600_v47 }
 0x28e   : > { %v1876_v4 = vpop.f32.mrb[0].mxu0 }
 0x28f   : > { %v2837_v5 = vadd.f32 %v1876_v4, %v1761_v3  ;;  %v726_v25 = vpop.f32.mrb[1].mxu0 }
 0x290   : > { %v2839_v45 = vadd.f32 %v1761_v3, %v726_v25 }
 0x292   : > { %v1879_v6 = vpop.f32.mrb[2].mxu0  ;;  %1902 = vmatprep.mubr.msk.f32.mxu1 %vm347_vm0, %v2839_v45 }
 0x293   : > { %v2843_v30 = vadd.f32 %v1879_v6, %v1761_v3  ;;  %v736_v7 = vpop.f32.mrb[3].mxu0 }
 0x294   : > { %v2845_v38 = vadd.f32 %v1761_v3, %v736_v7 }
 0x296   : > { %v1882_v9 = vpop.f32.mrb[4].mxu0 }
 0x297   : > { %v2847_v12 = vadd.f32 %v1882_v9, %v1761_v3  ;;  %v746_v13 = vpop.f32.mrb[5].mxu0 }
 0x298   : > { %v2849_v14 = vadd.f32 %v1761_v3, %v746_v13 }
 0x29a   : > { %v1885_v54 = vpop.f32.mrb[6].mxu0 }
 0x29b   : > { %v2851_v18 = vadd.f32 %v1885_v54, %v1761_v3  ;;  %v756_v19 = vpop.f32.mrb[7].mxu0 }
 0x29c   : > { %v2853_v22 = vadd.f32 %v1761_v3, %v756_v19 }
 0x29e   : > { %v1888_v16 = vpop.f32.mrb[8].mxu0 }
 0x29f   : > { %v772_v26 = vadd.f32 %v1888_v16, %v1761_v3  ;;  %v766_v55 = vpop.f32.mrb[9].mxu0 }
 0x2a0   : > { %v767_v27 = vadd.f32 %v1761_v3, %v766_v55 }
 0x2a2   : > { %v2070_v31 = vpack.i.bf16 %v772_v26, %v767_v27  ;;  %v1891_v32 = vpop.f32.mrb[10].mxu0 }
 0x2a3   : > { %v782_v34 = vadd.f32 %v1891_v32, %v1761_v3  ;;  %v776_v20 = vpop.f32.mrb[11].mxu0 }
 0x2a4   : > { %v777_v39 = vadd.f32 %v1761_v3, %v776_v20  ;;  %2071 = vrot.lane.b32.xlu0 %v2070_v31, %s2343_s26 }
 0x2a6   : > { %v2075_v40 = vpack.i.bf16 %v782_v34, %v777_v39  ;;  %v1894_v1 = vpop.f32.mrb[12].mxu0 }
 0x2a7   : > { %v792_v41 = vadd.f32 %v1894_v1, %v1761_v3  ;;  %v786_v43 = vpop.f32.mrb[13].mxu0 }
 0x2a8   : > { %v787_v10 = vadd.f32 %v1761_v3, %v786_v43  ;;  %2076 = vrot.lane.b32.xlu1 %v2075_v40, %s2343_s26 }
 0x2aa   : > { %v2080_v46 = vpack.i.bf16 %v792_v41, %v787_v10  ;;  %v1897_v24 = vpop.f32.mrb[14].mxu0 }
 0x2ab   : > { %v802_v36 = vadd.f32 %v1897_v24, %v1761_v3  ;;  %v796_v49 = vpop.f32.mrb[15].mxu0 }
 0x2ac   : > { %v797_v50 = vadd.f32 %v1761_v3, %v796_v49  ;;  %2081 = vrot.lane.b32.xlu1 %v2080_v46, %s2343_s26 }
 0x2ae   : > { %v2085_v51 = vpack.i.bf16 %v802_v36, %v797_v50 }
 0x2b0   : > { %2086 = vrot.lane.b32.xlu1 %v2085_v51, %s2343_s26 }
 0x316   : > { %v2072_v11 = vpop.permute.xlu0 %2071 }
 0x317   : > { %v2074_v52 = vunpack.i.h.bf16 %v2072_v11  ;;  %v2073_v28 = vunpack.i.l.bf16 %v2072_v11 }
 0x319   : > { %v1962_v29 = vpack.c.bf16 %v2074_v52, %v2073_v28 }
 0x31a   : > { %v2077_v53 = vpop.permute.xlu1 %2076 }
 0x31b   : > { %v2079_v56 = vunpack.i.h.bf16 %v2077_v53  ;;  %v2078_v57 = vunpack.i.l.bf16 %v2077_v53  ;;  %1964 = vmatprep.subr.msk.bf16.mxu1 %vm2857_vm1, %v1962_v29 }
 0x31c   : > { %1967 = vmatpush3.bf16.xpose.msk.msra.mxu1 %vm2857_vm1, %v1962_v29 }
 0x31d   : > { %v1968_v58 = vpack.c.bf16 %v2079_v56, %v2078_v57 }
 0x31e   : > { %v2082_v17 = vpop.permute.xlu1 %2081 }
 0x31f   : > { %v2084_v59 = vunpack.i.h.bf16 %v2082_v17  ;;  %v2083_v35 = vunpack.i.l.bf16 %v2082_v17  ;;  %1970 = vmatprep.subr.msk.bf16.mxu1 %vm2857_vm1, %v1968_v58 }
 0x321   : > { %v1974_v60 = vpack.c.bf16 %v2084_v59, %v2083_v35 }
 0x322   : > { %v2087_v37 = vpop.permute.xlu1 %2086 }
 0x323   : > { %1903 = vmatmul.mubr.msk.f32.vlgmr.msra.gmra.mrb[0].mxu1 %vm347_vm0, %v2837_v5  ;;  %v2089_v61 = vunpack.i.h.bf16 %v2087_v37  ;;  %v2088_v63 = vunpack.i.l.bf16 %v2087_v37 }
 0x324   : > { %1973 = vmatpush3.bf16.xpose.msk.msra.mxu1 %vm2857_vm1, %v1968_v58  ;;  %1909 = vmatprep.mubr.msk.f32.mxu1 %vm347_vm0, %v2845_v38 }
 0x325   : > { %1976 = vmatprep.subr.msk.bf16.mxu1 %vm2857_vm1, %v1974_v60  ;;  %v1980_v2 = vpack.c.bf16 %v2089_v61, %v2088_v63  ;;  %v2095_v63 = vpack.i.bf16 %v2843_v30, %v2845_v38 }
 0x32b   : > { %1910 = vmatmul.mubr.msk.f32.vlgmr.msra.gmra.mrb[2].mxu1 %vm347_vm0, %v2843_v30 }
 0x32c   : > { %1979 = vmatpush3.bf16.xpose.msk.msra.mxu1 %vm2857_vm1, %v1974_v60  ;;  %1916 = vmatprep.mubr.msk.f32.mxu1 %vm347_vm0, %v2849_v14 }
 0x32d   : > { %1982 = vmatprep.subr.msk.bf16.mxu1 %vm2857_vm1, %v1980_v2 }
 0x333   : > { %1917 = vmatmul.mubr.msk.f32.vlgmr.msra.gmra.mrb[4].mxu1 %vm347_vm0, %v2847_v12 }
 0x334   : > { %1985 = vmatpush3.bf16.xpose.msk.msra.mxu1 %vm2857_vm1, %v1980_v2  ;;  %1923 = vmatprep.mubr.msk.f32.mxu1 %vm347_vm0, %v2853_v22  ;;  %v2100_v2 = vpack.i.bf16 %v2847_v12, %v2849_v14 }
 0x33b   : > { %1924 = vmatmul.mubr.msk.f32.vlgmr.msra.gmra.mrb[6].mxu1 %vm347_vm0, %v2851_v18 }
 0x3f6   : > { %v1904_v21 = vpop.f32.mrb[0].mxu1 }
 0x3f7   : > { %v887_v47 = vpop.f32.mrb[1].mxu1  ;;  %v1173_v3 = vsel %vm1169_vm2, %v1904_v21, -inf }
 0x3f8   : > { %1174 = vmax.xlane.f32.xlu0 %v1173_v3  ;;  %v1170_v4 = vsel %vm1169_vm2, %v887_v47, -inf  ;;  %v2090_v3 = vpack.i.bf16 %v2837_v5, %v2839_v45  ;;  %v2105_v5 = vpack.i.bf16 %v2851_v18, %v2853_v22 }
 0x3fc   : > { %1171 = vmax.xlane.f32.xlu0 %v1170_v4 }
 0x3fe   : > { %v1911_v25 = vpop.f32.mrb[2].mxu1 }
 0x3ff   : > { %v978_v6 = vpop.f32.mrb[3].mxu1  ;;  %v1179_v7 = vsel %vm1169_vm2, %v1911_v25, -inf }
 0x400   : > { %1180 = vmax.xlane.f32.xlu0 %v1179_v7  ;;  %v1176_v9 = vsel %vm1169_vm2, %v978_v6, -inf }
 0x401   : > { %1177 = vmax.xlane.f32.xlu1 %v1176_v9 }
 0x406   : > { %v1918_v13 = vpop.f32.mrb[4].mxu1 }
 0x407   : > { %v1069_v54 = vpop.f32.mrb[5].mxu1  ;;  %v1185_v16 = vsel %vm1169_vm2, %v1918_v13, -inf }
 0x408   : > { %v1182_v19 = vsel %vm1169_vm2, %v1069_v54, -inf }
 0x409   : > { %1183 = vmax.xlane.f32.xlu0 %v1182_v19 }
 0x40d   : > { %1186 = vmax.xlane.f32.xlu0 %v1185_v16 }
 0x40e   : > { %v1925_v26 = vpop.f32.mrb[6].mxu1 }
 0x40f   : > { %v1160_v55 = vpop.f32.mrb[7].mxu1  ;;  %v1191_v31 = vsel %vm1169_vm2, %v1925_v26, -inf }
 0x410   : > { %v1188_v27 = vsel %vm1169_vm2, %v1160_v55, -inf }
 0x411   : > { %1189 = vmax.xlane.f32.xlu1 %v1188_v27 }
 0x415   : > { %1192 = vmax.xlane.f32.xlu1 %v1191_v31 }
 0x485   : > { %v1175_v32 = vpop.xlane.xlu0 %1174 }
 0x486   : > { %v1195_v34 = vsub.f32 %v1904_v21, %v1175_v32 }
 0x488   : > { %v1204_v20 = vmul.f32 1.442695, %v1195_v34 }
 0x489   : > { %v1172_v39 = vpop.xlane.xlu0 %1171 }
 0x48a   : > { %2142 = vpow2.f32 %v1204_v20  ;;  %v1194_v40 = vsub.f32 %v887_v47, %v1172_v39 }
 0x48c   : > { %v1202_v1 = vmul.f32 1.442695, %v1194_v40 }
 0x48d   : > { %v1181_v41 = vpop.xlane.xlu0 %1180 }
 0x48e   : > { %2144 = vpow2.f32 %v1202_v1  ;;  %v1197_v43 = vsub.f32 %v1911_v25, %v1181_v41  ;;  %v1178_v10 = vpop.xlane.xlu1 %1177 }
 0x48f   : > { %v1196_v46 = vsub.f32 %v978_v6, %v1178_v10 }
 0x490   : > { %v1208_v24 = vmul.f32 1.442695, %v1197_v43 }
 0x491   : > { %v1206_v36 = vmul.f32 1.442695, %v1196_v46 }
 0x492   : > { %2146 = vpow2.f32 %v1208_v24 }
 0x493   : > { %2148 = vpow2.f32 %v1206_v36 }
 0x494   : > { %v2899_v49 = vpop.eup %2142 }
 0x495   : > { %v1221_v50 = vsel %vm1169_vm2, %v2899_v49, 0.0 }
 0x496   : > { %1222 = vadd.xlane.f32.xlu0 %v1221_v50  ;;  %v1184_v51 = vpop.xlane.xlu0 %1183 }
 0x497   : > { %v1198_v52 = vsub.f32 %v1069_v54, %v1184_v51 }
 0x498   : > { %v2145_v11 = vpop.eup %2144 }
 0x499   : > { %v1218_v28 = vsel %vm1169_vm2, %v2145_v11, 0.0  ;;  %v1210_v56 = vmul.f32 1.442695, %v1198_v52 }
 0x49a   : > { %1219 = vadd.xlane.f32.xlu0 %v1218_v28  ;;  %v1187_v23 = vpop.xlane.xlu0 %1186 }
 0x49b   : > { %v1199_v29 = vsub.f32 %v1918_v13, %v1187_v23 }
 0x49c   : > { %v2147_v53 = vpop.eup %2146 }
 0x49d   : > { %v1212_v57 = vmul.f32 1.442695, %v1199_v29  ;;  %v1227_v58 = vsel %vm1169_vm2, %v2147_v53, 0.0  ;;  %v2149_v17 = vpop.eup %2148 }
 0x49e   : > { %1228 = vadd.xlane.f32.xlu1 %v1227_v58  ;;  %v1224_v59 = vsel %vm1169_vm2, %v2149_v17, 0.0  ;;  %v1190_v21 = vpop.xlane.xlu1 %1189 }
 0x49f   : > { %2150 = vpow2.f32 %v1212_v57  ;;  %v1200_v25 = vsub.f32 %v1160_v55, %v1190_v21 }
 0x4a0   : > { %2152 = vpow2.f32 %v1210_v56 }
 0x4a1   : > { %v1214_v7 = vmul.f32 1.442695, %v1200_v25 }
 0x4a2   : > { %1225 = vadd.xlane.f32.xlu1 %v1224_v59  ;;  %v1193_v47 = vpop.xlane.xlu1 %1192 }
 0x4a3   : > { %v1201_v4 = vsub.f32 %v1925_v26, %v1193_v47 }
 0x4a5   : > { %v1216_v6 = vmul.f32 1.442695, %v1201_v4 }
 0x4a7   : > { %2154 = vpow2.f32 %v1216_v6 }
 0x4a8   : > { %2156 = vpow2.f32 %v1214_v7 }
 0x4a9   : > { %v2906_v35 = vpop.eup %2150 }
 0x4aa   : > { %v1233_v60 = vsel %vm1169_vm2, %v2906_v35, 0.0  ;;  %v2910_v37 = vpop.eup %2152 }
 0x4ab   : > { %1234 = vadd.xlane.f32.xlu0 %v1233_v60  ;;  %v1230_v61 = vsel %vm1169_vm2, %v2910_v37, 0.0 }
 0x4af   : > { %1231 = vadd.xlane.f32.xlu0 %v1230_v61 }
 0x4b1   : > { %v2920_v9 = vpop.eup %2154 }
 0x4b2   : > { %v1239_v30 = vsel %vm1169_vm2, %v2920_v9, 0.0  ;;  %v2924_v38 = vpop.eup %2156 }
 0x4b3   : > { %2096 = vrot.lane.b32.xlu1 %v2095_v63, %s2344_s15  ;;  %v1236_v12 = vsel %vm1169_vm2, %v2924_v38, 0.0 }
 0x4b7   : > { %2101 = vrot.lane.b32.xlu1 %v2100_v2, %s2344_s15 }
 0x4c5   : > { %2091 = vrot.lane.b32.xlu0 %v2090_v3, %s2344_s15 }
 0x4db   : > { %1240 = vadd.xlane.f32.xlu1 %v1239_v30 }
 0x4df   : > { %1237 = vadd.xlane.f32.xlu1 %v1236_v12 }
 0x4f0   : > { %2106 = vrot.lane.b32.xlu1 %v2105_v5, %s2344_s15 }
 0x523   : > { %v1223_v45 = vpop.xlane.xlu0 %1222 }
 0x527   : > { %v1220_v14 = vpop.xlane.xlu0 %1219 }
 0x528   : > { %2158 = vrcp.f32 %v1220_v14 }
 0x52b   : > { %v1229_v13 = vpop.xlane.xlu1 %1228 }
 0x52c   : > { %2160 = vrcp.f32 %v1229_v13 }
 0x52f   : > { %v1226_v54 = vpop.xlane.xlu1 %1225 }
 0x530   : > { %2162 = vrcp.f32 %v1226_v54 }
 0x531   : > { %2164 = vrcp.f32 %v1223_v45 }
 0x532   : > { %v2159_v19 = vpop.eup %2158 }
 0x533   : > { %v2097_v16 = vpop.permute.xlu1 %2096  ;;  %v1250_v26 = vmul.f32 %v2159_v19, %v2145_v11 }
 0x534   : > { %v2099_v55 = vunpack.i.h.bf16 %v2097_v16  ;;  %v2098_v27 = vunpack.i.l.bf16 %v2097_v16 }
 0x535   : > { %1930 = vmatprep.mubr.msk.f32.mxu1 %vm1169_vm2, %v1250_v26 }
 0x536   : > { %v1990_v31 = vpack.c.bf16 %v2099_v55, %v2098_v27  ;;  %v2161_v34 = vpop.eup %2160 }
 0x537   : > { %v1253_v20 = vmul.f32 %v2161_v34, %v2147_v53  ;;  %v2102_v40 = vpop.permute.xlu1 %2101 }
 0x538   : > { %v1235_v32 = vpop.xlane.xlu0 %1234  ;;  %1991 = vmatprep.subr.bf16.mxu0 %v1990_v31  ;;  %v2104_v41 = vunpack.i.h.bf16 %v2102_v40  ;;  %v2103_v43 = vunpack.i.l.bf16 %v2102_v40 }
 0x539   : > { %1993 = vmatpush3.bf16.msra.mxu0 %v1990_v31 }
 0x53a   : > { %v2163_v18 = vpop.eup %2162  ;;  %v1994_v50 = vpack.c.bf16 %v2104_v41, %v2103_v43 }
 0x53b   : > { %v1252_v22 = vmul.f32 %v2163_v18, %v2149_v17  ;;  %v2165_v36 = vpop.eup %2164 }
 0x53c   : > { %v1232_v39 = vpop.xlane.xlu0 %1231  ;;  %v1251_v11 = vmul.f32 %v2165_v36, %v2899_v49 }
 0x53d   : > { %2166 = vrcp.f32 %v1232_v39  ;;  %1937 = vmatprep.mubr.msk.f32.mxu0 %vm1169_vm2, %v1252_v22 }
 0x53e   : > { %2168 = vrcp.f32 %v1235_v32  ;;  %1938 = vmatmul.mubr.msk.f32.vlgmr.msra.gmra.mrb[16].mxu0 %vm1169_vm2, %v1253_v20 }
 0x540   : > { %v2092_v1 = vpop.permute.xlu0 %2091 }
 0x541   : > { %v2094_v10 = vunpack.i.h.bf16 %v2092_v1  ;;  %v2093_v46 = vunpack.i.l.bf16 %v2092_v1 }
 0x543   : > { %v1986_v24 = vpack.c.bf16 %v2094_v10, %v2093_v46 }
 0x545   : > { %1987 = vmatprep.subr.bf16.mxu1 %v1986_v24 }
 0x546   : > { %1989 = vmatpush3.bf16.msra.mxu1 %v1986_v24 }
 0x547   : > { %v2167_v51 = vpop.eup %2166  ;;  %1995 = vmatprep.subr.bf16.mxu1 %v1994_v50 }
 0x548   : > { %v2169_v52 = vpop.eup %2168  ;;  %v1254_v28 = vmul.f32 %v2167_v51, %v2910_v37 }
 0x549   : > { %1931 = vmatmul.mubr.msk.f32.vlgmr.msra.gmra.mrb[8].mxu1 %vm1169_vm2, %v1251_v11  ;;  %v1255_v23 = vmul.f32 %v2169_v52, %v2906_v35 }
 0x54a   : > { %1997 = vmatpush3.bf16.msra.mxu1 %v1994_v50  ;;  %1944 = vmatprep.mubr.msk.f32.mxu1 %vm1169_vm2, %v1254_v28 }
 0x54d   : > { %1945 = vmatmul.mubr.msk.f32.vlgmr.msra.gmra.mrb[10].mxu1 %vm1169_vm2, %v1255_v23 }
 0x568   : > { %v1241_v29 = vpop.xlane.xlu1 %1240 }
 0x569   : > { %2170 = vrcp.f32 %v1241_v29 }
 0x56c   : > { %v1238_v53 = vpop.xlane.xlu1 %1237 }
 0x56d   : > { %2172 = vrcp.f32 %v1238_v53 }
 0x570   : > { %v2107_v56 = vpop.permute.xlu1 %2106 }
 0x571   : > { %v2109_v49 = vunpack.i.h.bf16 %v2107_v56  ;;  %v2108_v57 = vunpack.i.l.bf16 %v2107_v56 }
 0x573   : > { %v1998_v58 = vpack.c.bf16 %v2109_v49, %v2108_v57  ;;  %v2171_v17 = vpop.eup %2170 }
 0x574   : > { %v1257_v37 = vmul.f32 %v2171_v17, %v2920_v9 }
 0x575   : > { %1999 = vmatprep.subr.bf16.mxu0 %v1998_v58 }
 0x576   : > { %2001 = vmatpush3.bf16.msra.mxu0 %v1998_v58 }
 0x577   : > { %v2173_v59 = vpop.eup %2172 }
 0x578   : > { %v1256_v60 = vmul.f32 %v2173_v59, %v2924_v38 }
 0x57a   : > { %1951 = vmatprep.mubr.msk.f32.mxu0 %vm1169_vm2, %v1256_v60 }
 0x57b   : > { %1952 = vmatmul.mubr.msk.f32.vlgmr.msra.gmra.mrb[18].mxu0 %vm1169_vm2, %v1257_v37 }
 0x611   : > { %v1939_v35 = vpop.f32.mrb[16].mxu0 }
 0x612   : > { %v1609_v61 = vadd.f32 %v1939_v35, %v2771_v8  ;;  %v1423_v63 = vpop.f32.mrb[17].mxu0 }
 0x613   : > { %v1608_v2 = vadd.f32 %v1423_v63, %v2762_v62 }
 0x614   : > { %1617 = vst.msk [vmem:[%s325_s23 + $0x18] sm:$0xff] %vm347_vm0, %v1609_v61 }
 0x615   : > { %1616 = vst.msk [vmem:[%s325_s23 + $0x10] sm:$0xff] %vm347_vm0, %v1608_v2 }
 0x61c   : > { %v1932_v21 = vpop.f32.mrb[8].mxu1 }
 0x61d   : > { %v1607_v47 = vadd.f32 %v1932_v21, %v2758_v44  ;;  %v1336_v3 = vpop.f32.mrb[9].mxu1 }
 0x61e   : > { %v1606_v4 = vadd.f32 %v1336_v3, %v2749_v48 }
 0x61f   : > { %1615 = vst.msk [vmem:[%s325_s23 + $0x8] sm:$0xff] %vm347_vm0, %v1607_v47 }
 0x620   : > { %1614 = vst.msk [vmem:[%s325_s23] sm:$0xff] %vm347_vm0, %v1606_v4  ;;  %v1946_v8 = vpop.f32.mrb[10].mxu1 }
 0x621   : > { %v1611_v62 = vadd.f32 %v1946_v8, %v2786_v0  ;;  %v1510_v25 = vpop.f32.mrb[11].mxu1 }
 0x622   : > { %v1610_v6 = vadd.f32 %v1510_v25, %v2779_v15 }
 0x623   : > { %1619 = vst.msk [vmem:[%s325_s23 + $0x28] sm:$0xff] %vm347_vm0, %v1611_v62 }
 0x624   : > { %1618 = vst.msk [vmem:[%s325_s23 + $0x20] sm:$0xff] %vm347_vm0, %v1610_v6 }
 0x64e   : > { %v1953_v44 = vpop.f32.mrb[18].mxu0 }
 0x64f   : > { %v1613_v48 = vadd.f32 %v1953_v44, %v2800_v42  ;;  %v1597_v7 = vpop.f32.mrb[19].mxu0 }
 0x650   : > { %v1612_v15 = vadd.f32 %v1597_v7, %v2790_v33 }
 0x651   : > { %1621 = vst.msk [vmem:[%s325_s23 + $0x38] sm:$0xff] %vm347_vm0, %v1613_v48 }
 0x652   : > { %1620 = vst.msk [vmem:[%s325_s23 + $0x30] sm:$0xff] %vm347_vm0, %v1612_v15 }
 0x653   : > { %2275 = shalt.err (!%p2272_p6)
}
 0x654   : > { %s2276_s4 = scalar_lea.hbm %s2961_s18, 1024  ;;  %s2280_s30 = scalar_lea.hbm %s3016_s6, 2048 }
 0x655   : > { %p2277_p8 = scmp.ne.s32.totalorder %s2961_s18, %s2276_s4  ;;  %p2281_p4 = scmp.lt.u32.totalorder %s2961_s18, %s3016_s6 }
 0x656   : > { %p2282_p11 = scmp.lt.u32.totalorder %s2280_s30, %s2276_s4  ;;  %p2284_p3 = scmp.lt.u32.totalorder %s2276_s4, %s2961_s18 }
 0x657   : > { %p2278_p10 = pnand %p2277_p8, %p2477_p12 }
 0x658   : > { %p2283_p13 = por %p2282_p11, %p2281_p4 }
 0x659   : > { %p2279_p0 = pneg %p2278_p10 }
 0x65a   : > { %p2285_p7 = por %p2284_p3, %p2283_p13 }
 0x65c   : > { %p2286_p9 = pnand %p2285_p7, %p2279_p0 }
 0x65e   : > { %2289 = shalt.err (!%p2286_p9)
}
 0x65f   : > { %s2346_s8 = smov 128   ;;  %s2347_s26 = smov 8  }
 0x660   : > { %2010 = dma.vmem_to_hbm [thread:$0]  (%p2477_p12), %s2963_s7, 1024, %s2961_s18, %s1623_s25, %s2346_s8, %s2346_s8, %s2347_s26  }
 0x661 PF: > { %s1652_s15 = sand.u32 1, %s2324_s21   ;;  %p3049_p1 = scmp.ne.s32.totalorder %s3031_s28, 0 }
 0x662   : > { %p3050_p5 = scmp.ge.s32.totalorder %s2336_s24, 2  ;;  %s1653_s23 = scalar_lea.sflag [#allocation4], %s1652_s15 }
 0x664   : > { %p2024_p2 = pnand %p3050_p5, %p3049_p1 }
 0x666   : > { %2319 = dma.done.wait (!%p2024_p2), %s1653_s23, 1024  }
 0x667   : > { %2321 = vsyncadd (!%p2024_p2), %s1653_s23, 4294966272  ;;  %s3051_s24 = sld [smem:[#allocation14_spill]]  ;;  %s3052_s16 = sld [smem:[#allocation13_spill]] }
 0x668   : > { %s3053_s23 = sld [smem:[#allocation15_spill]]  ;;  %s3054_s21 = smov %s2328_s22 }
 0x66d   : > { %p22_p6 = scmp.ge.s32.totalorder %s3051_s24, 4   ;;  %s3055_s22 = smov %s3052_s16 }
 0x66f   :  { %24 = sbr.rel (!%p22_p6) target bundleno = 10 (0xa), region = 106 }
 0x676   :  { %1658 = vsyncpa [#allocation3], 1 }
 0x677   :  { %1660 = vsyncpa [#allocation3 + $0x1], 1 }
 0x678   :  { %1661 = vsyncpa [#allocation6], 1 }
 0x679   :  { %1663 = vsyncpa [#allocation6 + $0x1], 1 }
 0x67a   :  { %1664 = vsyncpa [#allocation4], 1 }
 0x67b   :  { %1666 = vsyncpa [#allocation4 + $0x1], 1 }

</bundles_post_ra>
